<compile_context>
chip_gen: v7x
topology: tpu7x:2x2x1
jax: 0.10.0
libtpu: 0.0.40
codegen_flags: <defaults>
</compile_context>

<pallas_src>
import jax
import jax.numpy as jnp
from jax.experimental import pallas as pl
from jax.experimental.pallas import tpu as pltpu


def _pointwise_kernel(x_ref, w_ref, b_ref, o_ref):
    # x_ref: (1, Cin, TS)   activation tile, spatial on lanes
    # w_ref: (Cout, Cin)    resident weight (constant-indexed block)
    # b_ref: (Cout, 1)      resident bias
    # o_ref: (1, Cout, TS)  output tile, spatial on lanes -> unmasked stores
    x = x_ref[0]                                   # (Cin, TS)
    w = w_ref[...]                                 # (Cout, Cin)
    b = b_ref[...].astype(jnp.float32)             # (Cout, 1)
    cout, cin = w.shape
    ts = x.shape[-1]

    if cin <= 16 and cout <= 16:
        # VPU path: tiny channel counts would waste the MXU's padded K=128/256.
        xf = x.astype(jnp.float32)
        wf = w.astype(jnp.float32)
        acc = jnp.zeros((cout, ts), jnp.float32)
        for k in range(cin):                       # static unroll, Cin is small
            acc = acc + wf[:, k:k + 1] * xf[k:k + 1, :]
    else:
        # MXU path for real channel counts; f32 accumulation.
        acc = jnp.dot(w, x, preferred_element_type=jnp.float32)

    o_ref[0] = (acc + b).astype(o_ref.dtype)


def _round_up(x, m):
    return (x + m - 1) // m * m


def _choose_spatial_tile(m, max_tile=2048):
    """Largest 128-multiple tile (<= max_tile) that divides ceil128(m)."""
    m128 = _round_up(m, 128)
    for t in (max_tile, 1024, 512, 256, 128):
        if t <= max_tile and m128 % t == 0:
            return t
    return 128


def pointwise_conv_pallas(x_nchw, weight, bias, *, max_tile=2048):
    """1x1 conv.  x_nchw: (N, Cin, H, W); weight: (Cout, Cin, 1, 1); bias: (Cout,)."""
    N, Cin, H, W = x_nchw.shape
    Cout = weight.shape[0]
    M = H * W

    x3 = x_nchw.reshape(N, Cin, M)            # free reshape, no transpose
    w_mat = weight.reshape(Cout, Cin)         # (Cout, Cin)
    b_col = bias.reshape(Cout, 1)             # (Cout, 1)

    tile_s = _choose_spatial_tile(M, max_tile)
    num_tiles = pl.cdiv(M, tile_s)            # partial tail block masked by Pallas

    out3 = pl.pallas_call(
        _pointwise_kernel,
        out_shape=jax.ShapeDtypeStruct((N, Cout, M), x_nchw.dtype),
        grid_spec=pltpu.PrefetchScalarGridSpec(
            num_scalar_prefetch=0,
            grid=(N, num_tiles),
            in_specs=[
                pl.BlockSpec((1, Cin, tile_s), lambda n, j: (n, 0, j)),
                pl.BlockSpec((Cout, Cin), lambda n, j: (0, 0)),   # stays resident
                pl.BlockSpec((Cout, 1), lambda n, j: (0, 0)),     # stays resident
            ],
            out_specs=pl.BlockSpec((1, Cout, tile_s), lambda n, j: (n, 0, j)),
        ),
        compiler_params=pltpu.CompilerParams(
            # Fully parallel grid: lets v7x's 2 TensorCores share the work;
            # harmless on single-core v5e/v6e.
            dimension_semantics=("parallel", "parallel"),
        ),
    )(x3, w_mat, b_col)

    return out3.reshape(N, Cout, H, W)        # free reshape, no transpose


if __name__ == "__main__":
    key = jax.random.PRNGKey(0)
    k_x, k_w, k_b = jax.random.split(key, 3)

    N, Cin, H, W = 2, 4, 16, 16
    Cout = 8

    x = jax.random.normal(k_x, (N, Cin, H, W), dtype=jnp.float32)
    # Deterministic parameter init (mimics Conv2d's uniform(-1/sqrt(fan_in), +...)).
    fan_in = Cin * 1 * 1
    bound = 1.0 / (fan_in ** 0.5)
    weight = jax.random.uniform(k_w, (Cout, Cin, 1, 1), jnp.float32, -bound, bound)
    bias = jax.random.uniform(k_b, (Cout,), jnp.float32, -bound, bound)

    out = pointwise_conv_pallas(x, weight, bias)
    out = jax.block_until_ready(out)

    # Reference check (plain JAX einsum over channels).
    ref = jnp.einsum("nchw,oc->nohw", x, weight.reshape(Cout, Cin)) + bias[None, :, None, None]
    assert out.shape == (N, Cout, H, W)
    assert jnp.allclose(out, ref, atol=1e-5, rtol=1e-5)

    print("KERNEL_OK")
</pallas_src>

<mosaic_0001>
module attributes {stable_mosaic.version = 11 : i64} {
  func.func @_pointwise_kernel(%arg0: i32, %arg1: i32, %arg2: memref<1x4x256xf32, #tpu.memory_space<vmem>>, %arg3: memref<8x4xf32, #tpu.memory_space<vmem>>, %arg4: memref<8x1xf32, #tpu.memory_space<vmem>>, %arg5: memref<1x8x256xf32, #tpu.memory_space<vmem>>) attributes {dimension_semantics = [#tpu.dimension_semantics<parallel>, #tpu.dimension_semantics<parallel>], iteration_bounds = array<i64: 2, 1>, scalar_prefetch = 0 : i64, scratch_operands = 0 : i64, tpu.core_type = #tpu.core_type<tc>, window_params = [{transform_indices = @transform_0, window_bounds = array<i64: 1, 4, 256>}, {pipeline_mode = #tpu.pipeline_mode<synchronous>, transform_indices = @transform_1, window_bounds = array<i64: 8, 4>}, {pipeline_mode = #tpu.pipeline_mode<synchronous>, transform_indices = @transform_2, window_bounds = array<i64: 8, 1>}, {transform_indices = @transform_3, window_bounds = array<i64: 1, 8, 256>}]} {
    %c0 = arith.constant 0 : index
    %c0_0 = arith.constant 0 : index
    %c0_1 = arith.constant 0 : index
    %0 = vector.load %arg2[%c0, %c0_0, %c0_1] : memref<1x4x256xf32, #tpu.memory_space<vmem>>, vector<1x4x256xf32>
    %1 = vector.shape_cast %0 : vector<1x4x256xf32> to vector<4x256xf32>
    %c0_2 = arith.constant 0 : index
    %c0_3 = arith.constant 0 : index
    %2 = vector.load %arg3[%c0_2, %c0_3] : memref<8x4xf32, #tpu.memory_space<vmem>>, vector<8x4xf32>
    %c0_4 = arith.constant 0 : index
    %c0_5 = arith.constant 0 : index
    %3 = vector.load %arg4[%c0_4, %c0_5] : memref<8x1xf32, #tpu.memory_space<vmem>>, vector<8x1xf32>
    %cst = arith.constant 0.000000e+00 : f32
    %4 = vector.broadcast %cst : f32 to vector<8x256xf32>
    %5 = vector.extract_strided_slice %2 {offsets = [0, 0], sizes = [8, 1], strides = [1, 1]} : vector<8x4xf32> to vector<8x1xf32>
    %6 = vector.extract_strided_slice %1 {offsets = [0, 0], sizes = [1, 256], strides = [1, 1]} : vector<4x256xf32> to vector<1x256xf32>
    %7 = vector.broadcast %5 : vector<8x1xf32> to vector<8x256xf32>
    %8 = vector.broadcast %6 : vector<1x256xf32> to vector<8x256xf32>
    %9 = arith.mulf %7, %8 : vector<8x256xf32>
    %10 = arith.addf %4, %9 : vector<8x256xf32>
    %11 = vector.extract_strided_slice %2 {offsets = [0, 1], sizes = [8, 1], strides = [1, 1]} : vector<8x4xf32> to vector<8x1xf32>
    %12 = vector.extract_strided_slice %1 {offsets = [1, 0], sizes = [1, 256], strides = [1, 1]} : vector<4x256xf32> to vector<1x256xf32>
    %13 = vector.broadcast %11 : vector<8x1xf32> to vector<8x256xf32>
    %14 = vector.broadcast %12 : vector<1x256xf32> to vector<8x256xf32>
    %15 = arith.mulf %13, %14 : vector<8x256xf32>
    %16 = arith.addf %10, %15 : vector<8x256xf32>
    %17 = vector.extract_strided_slice %2 {offsets = [0, 2], sizes = [8, 1], strides = [1, 1]} : vector<8x4xf32> to vector<8x1xf32>
    %18 = vector.extract_strided_slice %1 {offsets = [2, 0], sizes = [1, 256], strides = [1, 1]} : vector<4x256xf32> to vector<1x256xf32>
    %19 = vector.broadcast %17 : vector<8x1xf32> to vector<8x256xf32>
    %20 = vector.broadcast %18 : vector<1x256xf32> to vector<8x256xf32>
    %21 = arith.mulf %19, %20 : vector<8x256xf32>
    %22 = arith.addf %16, %21 : vector<8x256xf32>
    %23 = vector.extract_strided_slice %2 {offsets = [0, 3], sizes = [8, 1], strides = [1, 1]} : vector<8x4xf32> to vector<8x1xf32>
    %24 = vector.extract_strided_slice %1 {offsets = [3, 0], sizes = [1, 256], strides = [1, 1]} : vector<4x256xf32> to vector<1x256xf32>
    %25 = vector.broadcast %23 : vector<8x1xf32> to vector<8x256xf32>
    %26 = vector.broadcast %24 : vector<1x256xf32> to vector<8x256xf32>
    %27 = arith.mulf %25, %26 : vector<8x256xf32>
    %28 = arith.addf %22, %27 : vector<8x256xf32>
    %29 = vector.broadcast %3 : vector<8x1xf32> to vector<8x256xf32>
    %30 = arith.addf %28, %29 : vector<8x256xf32>
    %c0_6 = arith.constant 0 : index
    %c0_7 = arith.constant 0 : index
    %c0_8 = arith.constant 0 : index
    %31 = vector.load %arg5[%c0_6, %c0_7, %c0_8] : memref<1x8x256xf32, #tpu.memory_space<vmem>>, vector<1x8x256xf32>
    %32 = vector.shape_cast %31 : vector<1x8x256xf32> to vector<8x256xf32>
    %33 = vector.shape_cast %30 : vector<8x256xf32> to vector<1x8x256xf32>
    tpu.vector_store %arg5[%c0_6, %c0_7, %c0_8], %33 {strides = array<i32>} : memref<1x8x256xf32, #tpu.memory_space<vmem>>, vector<1x8x256xf32>,
    return
  }
  func.func @transform_0(%arg0: i32, %arg1: i32) -> (i32, i32, i32) {
    %c0_i32 = arith.constant 0 : i32
    %c0_i32_0 = arith.constant 0 : i32
    return %arg0, %c0_i32, %arg1 : i32, i32, i32
  }
  func.func @transform_1(%arg0: i32, %arg1: i32) -> (i32, i32) {
    %c0_i32 = arith.constant 0 : i32
    %c0_i32_0 = arith.constant 0 : i32
    %c0_i32_1 = arith.constant 0 : i32
    return %c0_i32, %c0_i32_0 : i32, i32
  }
  func.func @transform_2(%arg0: i32, %arg1: i32) -> (i32, i32) {
    %c0_i32 = arith.constant 0 : i32
    %c0_i32_0 = arith.constant 0 : i32
    %c0_i32_1 = arith.constant 0 : i32
    return %c0_i32, %c0_i32_0 : i32, i32
  }
  func.func @transform_3(%arg0: i32, %arg1: i32) -> (i32, i32, i32) {
    %c0_i32 = arith.constant 0 : i32
    %c0_i32_0 = arith.constant 0 : i32
    return %arg0, %c0_i32, %arg1 : i32, i32, i32
  }
}

</mosaic_0001>

<bundles_post_ra>
// kernel: tpu_custom_call.1
= control target key start
LH: loop header
LB: loop body
LE: loop exit
PB: predicated region body
PF: predicated region fallthrough
CT: control target
= control target key end

     0   :  { %8 = vsyncpa [#allocation3], 0  ;;  %s718_s0 = inlined_call_operand.vmem [shape: f32[2,4,256], index: 0, kind: input, shape index: {}]   ;;  %s719_s1 = inlined_call_operand.vmem [shape: f32[8,4], index: 1, kind: input, shape index: {}]   ;;  %s720_s2 = inlined_call_operand.vmem [shape: f32[8,1], index: 2, kind: input, shape index: {}]   ;;  %s721_s3 = inlined_call_operand.hbm [shape: f32[2,8,256], index: 3, kind: output, shape index: {}]  }
   0x1   :  { %10 = vsyncpa [#allocation3 + $0x1], 0  ;;  %s596_s12 = smov 0   ;;  %s598_s13 = smov 0  }
   0x2   :  { %s600_s14 = smov 0   ;;  %s602_s15 = smov 0  }
   0x3   :  { %s604_s16 = smov 0   ;;  %s606_s17 = smov 0  }
   0x4 LB: > { %s411_s18 = sadd.s32 4294967295, %s569_s17   ;;  %s412_s19 = sadd.s32 4294967294, %s569_s17   ;;  %s569_s17 = sphi %s606_s17, %s16_s17   ;;  %s565_s16 = sphi %s604_s16, %s728_s16   ;;  %s561_s15 = sphi %s602_s15, %s727_s15   ;;  %s557_s14 = sphi %s600_s14, %s726_s14   ;;  %s553_s13 = sphi %s598_s13, %s725_s13   ;;  %s549_s12 = sphi %s596_s12, %s724_s12  }
   0x5   : > { %s28_s20 = sadd.s32 1, %s565_s16  ;;  %s107_s21 = sadd.s32 1, %s557_s14 }
   0x6   : > { %p30_p0 = scmp.ge.s32.totalorder %s28_s20, 2  ;;  %p117_p1 = scmp.ne.s32.totalorder %s557_s14, %s553_s13 }
   0x7   : > { %p118_p2 = scmp.eq.s32.totalorder %s411_s18, 1  ;;  %p123_p3 = scmp.ne.s32.totalorder %s553_s13, %s549_s12 }
   0x8   : > { %s730_s20 = smov (%p30_p0, %s28_s20), 0  ;;  %p124_p5 = scmp.eq.s32.totalorder %s412_s19, 1 }
   0x9   : > { %p636_p4 = por %p118_p2, %p117_p1  ;;  %s102_s23 = ssub.s32 %s565_s16, %s730_s20 }
   0xa   : > { %p415_p6 = scmp.ge.s32.totalorder %s569_s17, 1  ;;  %p105_p7 = scmp.eq.s32.totalorder %s102_s23, 0 }
   0xb   : > { %p643_p8 = por %p124_p5, %p123_p3  ;;  %p161_p9 = scmp.lt.s32.totalorder %s569_s17, 3 }
   0xc   : > { %s649_s25 = scalar_select %p105_p7, %s557_s14, %s107_s21  }
   0xd   : > { %p162_p10 = pnand %p415_p6, %p161_p9 }
   0xe   : > { %v201_v0 = vld [vmem:[%s719_s1] sm:$0xff] (!%p162_p10)  ;;  %v571_v1 = vmov (!%p162_p10), 0   ;;  %v572_v2 = vmov (!%p162_p10), 2   ;;  %v573_v3 = vmov (!%p162_p10), 1   ;;  %v574_v4 = vmov (!%p162_p10), 3   ;;  %p190_p11 = scmp.lt.s32.totalorder (!%p162_p10), %s561_s15, 1 }
   0xf   : > { %165 = sbr.rel (%p162_p10) target bundleno = 173 (0xad), region = 32  ;;  %485 = vset.pattern.permute.xlu0 (!%p162_p10), %v571_v1  ;;  %487 = vset.pattern.permute.xlu1 (!%p162_p10), %v572_v2  ;;  %v202_v5 = vld [vmem:[%s720_s2] sm:$0xff] (!%p162_p10)  ;;  %v209_v6 = vlaneseq (!%p162_p10)  ;;  %s186_s8 = sand.u32 (!%p162_p10), 1, %s553_s13  }
  0x10   : > { %205 = vperm.xlu0 (!%p162_p10), %485, %v201_v0   ;;  %258 = vperm.xlu1 (!%p162_p10), %487, %v201_v0   ;;  %s416_s9 = sshll.u32 (!%p162_p10), %s186_s8, 4  ;;  %s425_s10 = sshll.u32 (!%p162_p10), %s561_s15, 8 }
  0x11   : > { %v210_v7 = vshrl.u32 (!%p162_p10), %v209_v6, 7  ;;  %s188_s11 = scalar_lea.vmem (!%p162_p10), [#allocation2], %s416_s9  ;;  %s669_s23 = scalar_lea.hbm (!%p162_p10), %s721_s3, %s425_s10 }
  0x12   : > { %s335_s18 = sshll.u32 (!%p162_p10), %s188_s11, 4  ;;  %s575_s27 = smov (!%p162_p10), [#allocation2]   ;;  %s671_s18 = int_to_ptr.vmem [resolvable:$true] %s335_s18 }
  0x13   : > { %v211_v8 = vsub.s32 (!%p162_p10), 0, %v210_v7  ;;  %v215_v9 = vsub.s32 (!%p162_p10), 4, %v210_v7  ;;  %v237_v10 = vsub.s32 (!%p162_p10), 1, %v210_v7  ;;  %v241_v11 = vsub.s32 (!%p162_p10), 5, %v210_v7  ;;  %s491_s26 = scalar_lea.vmem (!%p162_p10), %s671_s18, 256  ;;  %s495_s28 = sshll.u32 (!%p162_p10), %s575_s27, 4  ;;  %s496_s28 = int_to_ptr.vmem [resolvable:$false] %s495_s28 }
  0x14   : > { %486 = vset.pattern.permute.xlu0 (!%p162_p10), %v573_v3  ;;  %488 = vset.pattern.permute.xlu1 (!%p162_p10), %v574_v4  ;;  %v263_v13 = vsub.s32 (!%p162_p10), 2, %v210_v7  ;;  %v267_v14 = vsub.s32 (!%p162_p10), 6, %v210_v7  ;;  %v289_v15 = vsub.s32 (!%p162_p10), 3, %v210_v7  ;;  %v293_v16 = vsub.s32 (!%p162_p10), 7, %v210_v7  ;;  %p492_p12 = scmp.ne.s32.totalorder (!%p162_p10), %s671_s18, %s491_s26  ;;  %s497_s29 = scalar_lea.vmem (!%p162_p10), %s496_s28, 512 }
  0x15   : > { %232 = vperm.xlu0 (!%p162_p10), %486, %v201_v0   ;;  %284 = vperm.xlu1 (!%p162_p10), %488, %v201_v0   ;;  %p498_p1 = scmp.lt.s32.totalorder (!%p162_p10), %s671_s18, %s496_s28  ;;  %p499_p2 = scmp.lt.s32.totalorder (!%p162_p10), %s497_s29, %s491_s26 }
  0x16   : > { %s191_s30 = scalar_select %p190_p11, %s561_s15, 1 }
  0x17   : > { %s319_s15 = scalar_lea.sflag [#allocation3], %s186_s8  ;;  %p493_p13 = pnand %p492_p12, %p636_p4 }
  0x18   : > { %s424_s4 = sshll.u32 %s191_s30, 3  ;;  %p500_p3 = por %p499_p2, %p498_p1 }
  0x19   : > { %489 = vset.pattern.permute.xlu1 %v571_v1  ;;  %490 = vset.pattern.permute.xlu0 %v571_v1  ;;  %s197_s7 = scalar_lea.vmem %s718_s0, %s424_s4  ;;  %p494_p0 = pneg %p493_p13 }
  0x1a   : > { %311 = vperm.xlu1 %489, %v202_v5   ;;  %v200_v12 = vld [vmem:[%s197_s7] sm:$0xff] }
  0x1b   : > { %v212_v17 = vrot.slane %v200_v12, %v211_v8  ;;  %v216_v18 = vrot.slane %v200_v12, %v215_v9  ;;  %v238_v19 = vrot.slane %v200_v12, %v237_v10  ;;  %v242_v20 = vrot.slane %v200_v12, %v241_v11  ;;  %p501_p5 = pnand %p500_p3, %p494_p0 }
  0x1c   : > { %v264_v21 = vrot.slane %v200_v12, %v263_v13  ;;  %v268_v22 = vrot.slane %v200_v12, %v267_v14  ;;  %v290_v25 = vrot.slane %v200_v12, %v289_v15  ;;  %v294_v26 = vrot.slane %v200_v12, %v293_v16 }
  0x1d   : > { %v222_v27 = vrot.slane %v212_v17, %v211_v8  ;;  %v226_v28 = vrot.slane %v216_v18, %v211_v8  ;;  %v248_v29 = vrot.slane %v238_v19, %v237_v10  ;;  %v252_v30 = vrot.slane %v242_v20, %v237_v10 }
  0x1e   : > { %v274_v31 = vrot.slane %v264_v21, %v263_v13  ;;  %v278_v32 = vrot.slane %v268_v22, %v263_v13  ;;  %v300_v33 = vrot.slane %v290_v25, %v289_v15  ;;  %v304_v34 = vrot.slane %v294_v26, %v289_v15 }
  0x8f   : > { %v206_v23 = vpop.permute.xlu0 %205  ;;  %v259_v24 = vpop.permute.xlu1 %258 }
  0x90   : > { %v227_v37 = vmul.f32 %v222_v27, %v206_v23  ;;  %v228_v38 = vmul.f32 %v226_v28, %v206_v23  ;;  %v279_v41 = vmul.f32 %v274_v31, %v259_v24  ;;  %v280_v42 = vmul.f32 %v278_v32, %v259_v24 }
  0x94   : > { %v233_v35 = vpop.permute.xlu0 %232  ;;  %v285_v36 = vpop.permute.xlu1 %284 }
  0x95   : > { %v253_v39 = vmul.f32 %v248_v29, %v233_v35  ;;  %v254_v40 = vmul.f32 %v252_v30, %v233_v35  ;;  %v305_v45 = vmul.f32 %v300_v33, %v285_v36  ;;  %v306_v46 = vmul.f32 %v304_v34, %v285_v36 }
  0x97   : > { %v255_v43 = vadd.f32 %v253_v39, %v227_v37  ;;  %v256_v44 = vadd.f32 %v254_v40, %v228_v38 }
  0x99   : > { %v281_v47 = vadd.f32 %v279_v41, %v255_v43  ;;  %v282_v48 = vadd.f32 %v280_v42, %v256_v44  ;;  %v312_v49 = vpop.permute.xlu1 %311 }
  0x9b   : > { %v307_v50 = vadd.f32 %v305_v45, %v281_v47  ;;  %v308_v51 = vadd.f32 %v306_v46, %v282_v48 }
  0x9d   : > { %v314_v52 = vadd.f32 %v312_v49, %v307_v50  ;;  %v315_v53 = vadd.f32 %v312_v49, %v308_v51 }
  0x9f   : > { %316 = vst [vmem:[%s188_s11] sm:$0xff] %v314_v52  ;;  %317 = vst [vmem:[%s188_s11 + $0x8] sm:$0xff] %v315_v53 }
  0xa0   : > { %504 = shalt.err (!%p501_p5)
}
  0xa1   : > { %s505_s30 = scalar_lea.hbm %s669_s23, 256  ;;  %s509_s6 = scalar_lea.hbm %s721_s3, 512 }
  0xa2   : > { %p506_p6 = scmp.ne.s32.totalorder %s669_s23, %s505_s30  ;;  %p510_p10 = scmp.lt.u32.totalorder %s669_s23, %s721_s3 }
  0xa3   : > { %p511_p11 = scmp.lt.u32.totalorder %s509_s6, %s505_s30  ;;  %p513_p13 = scmp.lt.u32.totalorder %s505_s30, %s669_s23 }
  0xa4   : > { %p507_p7 = pnand %p506_p6, %p636_p4 }
  0xa5   : > { %p512_p12 = por %p511_p11, %p510_p10 }
  0xa6   : > { %p508_p9 = pneg %p507_p7 }
  0xa7   : > { %p514_p0 = por %p513_p13, %p512_p12 }
  0xa9   : > { %p515_p1 = pnand %p514_p0, %p508_p9 }
  0xab   : > { %518 = shalt.err (!%p515_p1)
}
  0xac   : > { %426 = dma.vmem_to_hbm [thread:$0]  (%p636_p4), %s671_s18, 256, %s669_s23, %s319_s15  }
  0xad PF: > { %p432_p2 = scmp.ge.s32.totalorder %s569_s17, 2  ;;  %s347_s9 = sand.u32 1, %s549_s12  }
  0xae   : > { %s348_s10 = scalar_lea.sflag [#allocation3], %s347_s9 }
  0xaf   : > { %p429_p3 = pnand %p432_p2, %p643_p8 }
  0xb1   : > { %544 = dma.done.wait (!%p429_p3), %s348_s10, 256  }
  0xb2   : > { %546 = vsyncadd (!%p429_p3), %s348_s10, 4294967040  ;;  %s16_s17 = sadd.s32 1, %s569_s17   ;;  %s724_s12 = smov %s553_s13 }
  0xb3   : > { %p13_p5 = scmp.ge.s32.totalorder %s16_s17, 4   ;;  %s725_s13 = smov %s557_s14 }
  0xb4   : > { %s726_s14 = smov %s649_s25  ;;  %s727_s15 = smov %s565_s16 }
  0xb5   : > { %s728_s16 = smov %s730_s20  ;;  %15 = sbr.rel (!%p13_p5) target bundleno = 4 (0x4), region = 67 }
  0xbc   :  { %353 = vsyncpa [#allocation3], 1 }
  0xbd   :  { %355 = vsyncpa [#allocation3 + $0x1], 1 }

</bundles_post_ra>
